<compile_context>
chip_gen: v7x
topology: tpu7x:2x2x1
jax: 0.10.0
libtpu: 0.0.40
codegen_flags: <defaults>
</compile_context>

<pallas_src>
import jax
import jax.numpy as jnp
from jax.experimental import pallas as pl
from jax.experimental.pallas import tpu as pltpu

EPS = 1e-5


# --------------------------------------------------------------------------- #
# Parameter-load-time weight preparation (run ONCE, outside the jitted call). #
# --------------------------------------------------------------------------- #
def prepare_mixer_weights(w_in, w_out, compute_dtype=None):
    """Split / transpose the torch.nn.Linear-layout weights once.

    w_in : (2D, D)  gated input projection, torch (out, in) layout
    w_out: (D, D)   output projection, torch (out, in) layout

    Returns (w_x_t, w_gate_t, w_out_t), each (D, D) with the contraction dim leading
    so the kernel feeds the MXU directly (no in-kernel relayout / per-call transpose).
    Pass compute_dtype=jnp.bfloat16 for ~2-3x MXU throughput and half the weight
    VMEM / DMA traffic; accumulation stays fp32 inside the kernel.
    """
    D = w_out.shape[0]
    w_x_t = jnp.asarray(w_in[:D]).T
    w_gate_t = jnp.asarray(w_in[D:]).T
    w_out_t = jnp.asarray(w_out).T
    if compute_dtype is not None:
        w_x_t = w_x_t.astype(compute_dtype)
        w_gate_t = w_gate_t.astype(compute_dtype)
        w_out_t = w_out_t.astype(compute_dtype)
    return (jax.block_until_ready(w_x_t),
            jax.block_until_ready(w_gate_t),
            jax.block_until_ready(w_out_t))


# --------------------------------------------------------------------------- #
# Kernels                                                                     #
# --------------------------------------------------------------------------- #
def _norm_and_mix(resid_f32, nw, wx, wg, wout, hid_out_ref, res_out_ref):
    """Shared tail: write fp32 residual, RMSNorm, gated projection mixer.

    resid_f32 : (TM, D) fp32 residual (already summed)
    nw        : (1, D)  fp32 RMSNorm weight
    wx, wg    : (D, D)  pre-transposed input-projection halves (contraction dim leading)
    wout      : (D, D)  pre-transposed output projection
    """
    # residual_in_fp32=True -> residual output stored in fp32; write it first so the
    # incoming residual tile can retire early.
    res_out_ref[...] = resid_f32.astype(res_out_ref.dtype)

    # RMSNorm in fp32 (norm.weight dtype).
    var = jnp.mean(resid_f32 * resid_f32, axis=-1, keepdims=True)
    xn = resid_f32 * jax.lax.rsqrt(var + EPS) * nw

    # MXU operand dtype follows the weight storage dtype. fp32 weights -> true-fp32
    # (HIGHEST) pass so results match an fp32 reference; bf16 weights -> fast default
    # path with fp32 accumulation.
    prec = (jax.lax.Precision.HIGHEST if wx.dtype == jnp.float32
            else jax.lax.Precision.DEFAULT)
    xc = xn.astype(wx.dtype)

    # Gate dot + SiLU folded first, then the x-part dot and product reusing the same
    # buffer -> fewer simultaneously-live (TM, D) fp32 temporaries.
    g = jnp.dot(xc, wg, preferred_element_type=jnp.float32, precision=prec)
    g = g * jax.nn.sigmoid(g)                                            # SiLU, fp32
    g = g * jnp.dot(xc, wx, preferred_element_type=jnp.float32, precision=prec)
    out = jnp.dot(g.astype(wout.dtype), wout,
                  preferred_element_type=jnp.float32, precision=prec)
    hid_out_ref[...] = out.astype(hid_out_ref.dtype)


def _block_kernel_res(hid_ref, res_ref, nw_ref, wx_ref, wg_ref, wout_ref,
                      hid_out_ref, res_out_ref):
    """Token tile with an incoming residual (residual cast to fp32 in-kernel)."""
    resid = hid_ref[...].astype(jnp.float32) + res_ref[...].astype(jnp.float32)
    _norm_and_mix(resid, nw_ref[...], wx_ref[...], wg_ref[...], wout_ref[...],
                  hid_out_ref, res_out_ref)


def _block_kernel_nores(hid_ref, nw_ref, wx_ref, wg_ref, wout_ref,
                        hid_out_ref, res_out_ref):
    """Token tile without an incoming residual (first block in a stack)."""
    resid = hid_ref[...].astype(jnp.float32)
    _norm_and_mix(resid, nw_ref[...], wx_ref[...], wg_ref[...], wout_ref[...],
                  hid_out_ref, res_out_ref)


# --------------------------------------------------------------------------- #
# Tile / VMEM sizing                                                          #
# --------------------------------------------------------------------------- #
def _round_up(x, m):
    return (x + m - 1) // m * m


def _vmem_budget_bytes():
    try:
        cap = pltpu.get_tpu_info().vmem_capacity_bytes
    except Exception:  # interpret mode / unknown chip
        cap = 64 * 1024 * 1024
    return int(cap * 0.85)  # ~15% headroom for Mosaic internal scratch / DMA descriptors


def _pick_tile_and_vmem(tokens, D, act_bytes, w_bytes, has_residual):
    budget = _vmem_budget_bytes()
    # Weights + norm weight are single-buffered (constant index_map, Buffered(1)).
    weight_bytes = 3 * D * D * w_bytes + D * 4

    def tile_bytes(tm):
        n_in = 2 if has_residual else 1
        io = 2 * (n_in * tm * D * act_bytes      # double-buffered token inputs
                  + tm * D * act_bytes           # hidden output
                  + tm * D * 4)                  # fp32 residual output
        tmp = 4 * tm * D * 4                     # live fp32 temporaries in the body
        return io + tmp

    # 512 on 128 MiB parts (v5e/v6e), 256 on v7x's 64 MiB/TC; halve further for big D.
    tm = 512 if (weight_bytes + tile_bytes(512) <= budget) else 256
    while tm > 16 and weight_bytes + tile_bytes(tm) > budget:
        tm //= 2
    tm = max(16, min(tm, _round_up(tokens, 16)))
    # Keep both TensorCores busy under dimension_semantics=("parallel",).
    if tokens >= 256 and pl.cdiv(tokens, tm) < 2:
        tm = _round_up(pl.cdiv(tokens, 2), 16)

    need = weight_bytes + tile_bytes(tm)
    vmem_limit = min(budget, max(int(need * 1.2) + (1 << 20), 32 * 1024 * 1024))
    return tm, vmem_limit


def _resident_spec(block_shape):
    """Constant-index BlockSpec; single-buffered (its block never changes)."""
    try:
        return pl.BlockSpec(block_shape, lambda i: (0, 0),
                            pipeline_mode=pl.Buffered(1))
    except TypeError:  # older jax without pipeline_mode on BlockSpec
        return pl.BlockSpec(block_shape, lambda i: (0, 0))


# --------------------------------------------------------------------------- #
# Forward                                                                     #
# --------------------------------------------------------------------------- #
@jax.jit
def hybrid_quamba_block(hidden_states, residual, norm_weight,
                        w_x_t, w_gate_t, w_out_t):
    """HybridQuambaBlock forward (non-fused add+norm, residual_in_fp32=True).

    hidden_states : (B, L, D)
    residual      : (B, L, D) or None
    norm_weight   : (D,)     RMSNorm weight (used in fp32)
    w_x_t, w_gate_t, w_out_t : (D, D) pre-laid-out weights from prepare_mixer_weights()
    Returns (hidden_states_out, residual_fp32), both (B, L, D).
    """
    B, L, D = hidden_states.shape
    tokens = B * L
    tm, vmem_limit = _pick_tile_and_vmem(
        tokens, D, hidden_states.dtype.itemsize, w_x_t.dtype.itemsize,
        residual is not None)
    grid = (pl.cdiv(tokens, tm),)   # partial tail block handled by Pallas (no pad/slice)

    hid2d = hidden_states.reshape(tokens, D)
    nw2d = norm_weight.reshape(1, D).astype(jnp.float32)

    tok_spec = pl.BlockSpec((tm, D), lambda i: (i, 0))
    nw_spec = _resident_spec((1, D))
    w_spec = _resident_spec((D, D))

    out_shape = (
        jax.ShapeDtypeStruct((tokens, D), hidden_states.dtype),
        jax.ShapeDtypeStruct((tokens, D), jnp.float32),   # residual_in_fp32=True
    )
    out_specs = [tok_spec, tok_spec]
    compiler_params = pltpu.CompilerParams(
        dimension_semantics=("parallel",),
        vmem_limit_bytes=vmem_limit,
    )

    if residual is None:
        hid_out, res_out = pl.pallas_call(
            _block_kernel_nores,
            out_shape=out_shape,
            grid_spec=pltpu.PrefetchScalarGridSpec(
                num_scalar_prefetch=0,
                grid=grid,
                in_specs=[tok_spec, nw_spec, w_spec, w_spec, w_spec],
                out_specs=out_specs,
            ),
            compiler_params=compiler_params,
        )(hid2d, nw2d, w_x_t, w_gate_t, w_out_t)
    else:
        # Residual passed in its native dtype; cast to fp32 inside the kernel.
        res2d = residual.reshape(tokens, D)
        hid_out, res_out = pl.pallas_call(
            _block_kernel_res,
            out_shape=out_shape,
            grid_spec=pltpu.PrefetchScalarGridSpec(
                num_scalar_prefetch=0,
                grid=grid,
                in_specs=[tok_spec, tok_spec, nw_spec, w_spec, w_spec, w_spec],
                out_specs=out_specs,
            ),
            compiler_params=compiler_params,
        )(hid2d, res2d, nw2d, w_x_t, w_gate_t, w_out_t)

    return hid_out.reshape(B, L, D), res_out.reshape(B, L, D)


# --------------------------------------------------------------------------- #
# Pure-JAX reference matching the PyTorch forward (non-fused path, true fp32) #
# --------------------------------------------------------------------------- #
def _reference(hidden_states, residual, norm_weight, w_in, w_out):
    h = hidden_states.astype(jnp.float32)
    resid = h if residual is None else h + residual.astype(jnp.float32)
    var = jnp.mean(resid * resid, axis=-1, keepdims=True)
    xn = resid * jax.lax.rsqrt(var + EPS) * norm_weight
    hi = jax.lax.Precision.HIGHEST
    z = jnp.dot(xn, w_in.T.astype(jnp.float32), precision=hi)
    D = hidden_states.shape[-1]
    x_part, gate = z[..., :D], z[..., D:]
    y = x_part * (gate * jax.nn.sigmoid(gate))
    out = jnp.dot(y, w_out.T.astype(jnp.float32), precision=hi)
    return out.astype(hidden_states.dtype), resid


if __name__ == "__main__":
    B, L, D = 2, 8, 32   # batch, seq, hidden dim

    key = jax.random.PRNGKey(0)
    k_h, k_r, k_nw, k_win, k_wout = jax.random.split(key, 5)

    hidden_states = jax.random.normal(k_h, (B, L, D), dtype=jnp.float32)
    residual = jax.random.normal(k_r, (B, L, D), dtype=jnp.float32)

    # deterministic synthetic parameters (shapes per the module instantiation)
    norm_weight = 1.0 + 0.01 * jax.random.normal(k_nw, (D,), dtype=jnp.float32)
    w_in = jax.random.normal(k_win, (2 * D, D), dtype=jnp.float32) / jnp.sqrt(D)
    w_out = jax.random.normal(k_wout, (D, D), dtype=jnp.float32) / jnp.sqrt(D)

    # ---- fp32-weight path (true-fp32 MXU, tight tolerance vs fp32 reference) ----
    wx32, wg32, wo32 = prepare_mixer_weights(w_in, w_out)       # once, at load time
    hid_out, res_out = hybrid_quamba_block(hidden_states, residual, norm_weight,
                                           wx32, wg32, wo32)
    jax.block_until_ready((hid_out, res_out))
    ref_hid, ref_res = _reference(hidden_states, residual, norm_weight, w_in, w_out)
    assert jnp.allclose(hid_out, ref_hid, atol=1e-4, rtol=1e-4), "hidden mismatch (fp32)"
    assert jnp.allclose(res_out, ref_res, atol=1e-5, rtol=1e-5), "residual mismatch (fp32)"

    # ---- residual=None case (first block in a stack) ----
    hid2, res2 = hybrid_quamba_block(hidden_states, None, norm_weight,
                                     wx32, wg32, wo32)
    jax.block_until_ready((hid2, res2))
    ref_hid2, ref_res2 = _reference(hidden_states, None, norm_weight, w_in, w_out)
    assert jnp.allclose(hid2, ref_hid2, atol=1e-4, rtol=1e-4), "hidden mismatch (nores)"
    assert jnp.allclose(res2, ref_res2, atol=1e-5, rtol=1e-5), "residual mismatch (nores)"

    # ---- bf16-weight path (recommended production storage: 2-3x MXU throughput) ----
    wxbf, wgbf, wobf = prepare_mixer_weights(w_in, w_out, compute_dtype=jnp.bfloat16)
    hid3, res3 = hybrid_quamba_block(hidden_states, residual, norm_weight,
                                     wxbf, wgbf, wobf)
    jax.block_until_ready((hid3, res3))
    assert jnp.allclose(hid3, ref_hid, atol=1e-1, rtol=1e-1), "hidden mismatch (bf16)"
    assert jnp.allclose(res3, ref_res, atol=1e-5, rtol=1e-5), "residual mismatch (bf16)"

    print("KERNEL_OK")
</pallas_src>

<mosaic_0001>
module attributes {stable_mosaic.version = 11 : i64} {
  func.func @_block_kernel_res(%arg0: i32, %arg1: memref<16x32xf32, #tpu.memory_space<vmem>>, %arg2: memref<16x32xf32, #tpu.memory_space<vmem>>, %arg3: memref<1x32xf32, #tpu.memory_space<vmem>>, %arg4: memref<32x32xf32, #tpu.memory_space<vmem>>, %arg5: memref<32x32xf32, #tpu.memory_space<vmem>>, %arg6: memref<32x32xf32, #tpu.memory_space<vmem>>, %arg7: memref<16x32xf32, #tpu.memory_space<vmem>>, %arg8: memref<16x32xf32, #tpu.memory_space<vmem>>) attributes {dimension_semantics = [#tpu.dimension_semantics<parallel>], iteration_bounds = array<i64: 1>, scalar_prefetch = 0 : i64, scratch_operands = 0 : i64, tpu.core_type = #tpu.core_type<tc>, window_params = [{transform_indices = @transform_0, window_bounds = array<i64: 16, 32>}, {transform_indices = @transform_1, window_bounds = array<i64: 16, 32>}, {pipeline_mode = #tpu.pipeline_mode<synchronous>, transform_indices = @transform_2, window_bounds = array<i64: 1, 32>}, {pipeline_mode = #tpu.pipeline_mode<synchronous>, transform_indices = @transform_3, window_bounds = array<i64: 32, 32>}, {pipeline_mode = #tpu.pipeline_mode<synchronous>, transform_indices = @transform_4, window_bounds = array<i64: 32, 32>}, {pipeline_mode = #tpu.pipeline_mode<synchronous>, transform_indices = @transform_5, window_bounds = array<i64: 32, 32>}, {transform_indices = @transform_6, window_bounds = array<i64: 16, 32>}, {transform_indices = @transform_7, window_bounds = array<i64: 16, 32>}]} {
    %c0 = arith.constant 0 : index
    %c0_0 = arith.constant 0 : index
    %0 = vector.load %arg1[%c0, %c0_0] : memref<16x32xf32, #tpu.memory_space<vmem>>, vector<16x32xf32>
    %c0_1 = arith.constant 0 : index
    %c0_2 = arith.constant 0 : index
    %1 = vector.load %arg2[%c0_1, %c0_2] : memref<16x32xf32, #tpu.memory_space<vmem>>, vector<16x32xf32>
    %2 = arith.addf %0, %1 : vector<16x32xf32>
    %c0_3 = arith.constant 0 : index
    %c0_4 = arith.constant 0 : index
    %3 = vector.load %arg3[%c0_3, %c0_4] : memref<1x32xf32, #tpu.memory_space<vmem>>, vector<1x32xf32>
    %c0_5 = arith.constant 0 : index
    %c0_6 = arith.constant 0 : index
    %4 = vector.load %arg4[%c0_5, %c0_6] : memref<32x32xf32, #tpu.memory_space<vmem>>, vector<32x32xf32>
    %c0_7 = arith.constant 0 : index
    %c0_8 = arith.constant 0 : index
    %5 = vector.load %arg5[%c0_7, %c0_8] : memref<32x32xf32, #tpu.memory_space<vmem>>, vector<32x32xf32>
    %c0_9 = arith.constant 0 : index
    %c0_10 = arith.constant 0 : index
    %6 = vector.load %arg6[%c0_9, %c0_10] : memref<32x32xf32, #tpu.memory_space<vmem>>, vector<32x32xf32>
    %c0_11 = arith.constant 0 : index
    %c0_12 = arith.constant 0 : index
    %7 = vector.load %arg8[%c0_11, %c0_12] : memref<16x32xf32, #tpu.memory_space<vmem>>, vector<16x32xf32>
    tpu.vector_store %arg8[%c0_11, %c0_12], %2 {strides = array<i32>} : memref<16x32xf32, #tpu.memory_space<vmem>>, vector<16x32xf32>,
    %8 = arith.mulf %2, %2 : vector<16x32xf32>
    %cst = arith.constant dense<0.000000e+00> : vector<16xf32>
    %9 = vector.multi_reduction <add>, %8, %cst [1] : vector<16x32xf32> to vector<16xf32>
    %10 = vector.shape_cast %9 : vector<16xf32> to vector<16x1xf32>
    %cst_13 = arith.constant 3.200000e+01 : f32
    %11 = vector.broadcast %cst_13 : f32 to vector<16x1xf32>
    %12 = arith.divf %10, %11 : vector<16x1xf32>
    %cst_14 = arith.constant 9.99999974E-6 : f32
    %13 = vector.broadcast %cst_14 : f32 to vector<16x1xf32>
    %14 = arith.addf %12, %13 : vector<16x1xf32>
    %15 = math.rsqrt %14 : vector<16x1xf32>
    %16 = vector.broadcast %15 : vector<16x1xf32> to vector<16x32xf32>
    %17 = arith.mulf %2, %16 : vector<16x32xf32>
    %18 = vector.broadcast %3 : vector<1x32xf32> to vector<16x32xf32>
    %19 = arith.mulf %17, %18 : vector<16x32xf32>
    %cst_15 = arith.constant dense<0.000000e+00> : vector<16x32xf32>
    %20 = tpu.matmul %19, %5, %cst_15 {dimension_numbers = #tpu.dot_dimension_numbers<[1], [0], [0], [1], [0, 0, 1, 1], [], []>, precision = #tpu.contract_precision<fp32>} : vector<16x32xf32>, vector<32x32xf32>, vector<16x32xf32> -> vector<16x32xf32>
    %21 = arith.negf %20 : vector<16x32xf32>
    %22 = math.exp %21 : vector<16x32xf32>
    %cst_16 = arith.constant 1.000000e+00 : f32
    %23 = vector.broadcast %cst_16 : f32 to vector<16x32xf32>
    %24 = arith.addf %23, %22 : vector<16x32xf32>
    %25 = arith.divf %23, %24 : vector<16x32xf32>
    %26 = arith.mulf %20, %25 : vector<16x32xf32>
    %cst_17 = arith.constant dense<0.000000e+00> : vector<16x32xf32>
    %27 = tpu.matmul %19, %4, %cst_17 {dimension_numbers = #tpu.dot_dimension_numbers<[1], [0], [0], [1], [0, 0, 1, 1], [], []>, precision = #tpu.contract_precision<fp32>} : vector<16x32xf32>, vector<32x32xf32>, vector<16x32xf32> -> vector<16x32xf32>
    %28 = arith.mulf %26, %27 : vector<16x32xf32>
    %cst_18 = arith.constant dense<0.000000e+00> : vector<16x32xf32>
    %29 = tpu.matmul %28, %6, %cst_18 {dimension_numbers = #tpu.dot_dimension_numbers<[1], [0], [0], [1], [0, 0, 1, 1], [], []>, precision = #tpu.contract_precision<fp32>} : vector<16x32xf32>, vector<32x32xf32>, vector<16x32xf32> -> vector<16x32xf32>
    %c0_19 = arith.constant 0 : index
    %c0_20 = arith.constant 0 : index
    %30 = vector.load %arg7[%c0_19, %c0_20] : memref<16x32xf32, #tpu.memory_space<vmem>>, vector<16x32xf32>
    tpu.vector_store %arg7[%c0_19, %c0_20], %29 {strides = array<i32>} : memref<16x32xf32, #tpu.memory_space<vmem>>, vector<16x32xf32>,
    return
  }
  func.func @transform_0(%arg0: i32) -> (i32, i32) {
    %c0_i32 = arith.constant 0 : i32
    %c0_i32_0 = arith.constant 0 : i32
    return %arg0, %c0_i32 : i32, i32
  }
  func.func @transform_1(%arg0: i32) -> (i32, i32) {
    %c0_i32 = arith.constant 0 : i32
    %c0_i32_0 = arith.constant 0 : i32
    return %arg0, %c0_i32 : i32, i32
  }
  func.func @transform_2(%arg0: i32) -> (i32, i32) {
    %c0_i32 = arith.constant 0 : i32
    %c0_i32_0 = arith.constant 0 : i32
    %c0_i32_1 = arith.constant 0 : i32
    return %c0_i32, %c0_i32_0 : i32, i32
  }
  func.func @transform_3(%arg0: i32) -> (i32, i32) {
    %c0_i32 = arith.constant 0 : i32
    %c0_i32_0 = arith.constant 0 : i32
    %c0_i32_1 = arith.constant 0 : i32
    return %c0_i32, %c0_i32_0 : i32, i32
  }
  func.func @transform_4(%arg0: i32) -> (i32, i32) {
    %c0_i32 = arith.constant 0 : i32
    %c0_i32_0 = arith.constant 0 : i32
    %c0_i32_1 = arith.constant 0 : i32
    return %c0_i32, %c0_i32_0 : i32, i32
  }
  func.func @transform_5(%arg0: i32) -> (i32, i32) {
    %c0_i32 = arith.constant 0 : i32
    %c0_i32_0 = arith.constant 0 : i32
    %c0_i32_1 = arith.constant 0 : i32
    return %c0_i32, %c0_i32_0 : i32, i32
  }
  func.func @transform_6(%arg0: i32) -> (i32, i32) {
    %c0_i32 = arith.constant 0 : i32
    %c0_i32_0 = arith.constant 0 : i32
    return %arg0, %c0_i32 : i32, i32
  }
  func.func @transform_7(%arg0: i32) -> (i32, i32) {
    %c0_i32 = arith.constant 0 : i32
    %c0_i32_0 = arith.constant 0 : i32
    return %arg0, %c0_i32 : i32, i32
  }
}

</mosaic_0001>

<bundles_post_ra>
// kernel: hybrid_quamba_block.1
= control target key start
LH: loop header
LB: loop body
LE: loop exit
PB: predicated region body
PF: predicated region fallthrough
CT: control target
= control target key end

     0   :  { %13 = vsyncpa [#allocation3], 0  ;;  %s2728_s0 = inlined_call_operand.hbm [shape: f32[16,32], index: 0, kind: input, shape index: {}]   ;;  %s2729_s1 = inlined_call_operand.hbm [shape: f32[16,32], index: 1, kind: input, shape index: {}]   ;;  %s2730_s2 = inlined_call_operand.vmem [shape: f32[1,32], index: 2, kind: input, shape index: {}]   ;;  %s2731_s3 = inlined_call_operand.hbm [shape: f32[32,32], index: 3, kind: input, shape index: {}]   ;;  %s2732_s4 = inlined_call_operand.hbm [shape: f32[32,32], index: 4, kind: input, shape index: {}]   ;;  %s2733_s5 = inlined_call_operand.hbm [shape: f32[32,32], index: 5, kind: input, shape index: {}]   ;;  %s2734_s6 = inlined_call_operand.hbm [shape: f32[16,32], index: 6, kind: output, shape index: {0}]   ;;  %s2735_s7 = inlined_call_operand.hbm [shape: f32[16,32], index: 7, kind: output, shape index: {1}]  }
   0x1   :  { %14 = vsyncpa [#allocation6], 0 }
   0x2   :  { %15 = vsyncpa [#allocation9], 0 }
   0x3   :  { %16 = vsyncpa [#allocation4], 0 }
   0x4   :  { %17 = vsyncpa [#allocation13], 0  ;;  %s2459_s24 = smov [#allocation5]   ;;  %s2460_s26 = smov [#allocation8]  }
   0x5   :  { %s35_s25 = sshll.u32 %s2459_s24, 4  ;;  %s61_s27 = sshll.u32 %s2460_s26, 4  ;;  %s36_s25 = int_to_ptr.vmem [resolvable:$true] %s35_s25  ;;  %s2508_s27 = int_to_ptr.vmem [resolvable:$true] %s61_s27 }
   0x6   :  { %s2295_s30 = scalar_lea.hbm %s2729_s1, 256 }
   0x7   :  { %p2296_p0 = scmp.ne.s32.totalorder %s2729_s1, %s2295_s30  ;;  %p2299_p1 = scmp.lt.u32.totalorder %s2295_s30, %s2729_s1 }
   0x9   :  { %p2301_p2 = pnand %p2299_p1, %p2296_p0 }
   0xb   :  { %2304 = shalt.err (!%p2301_p2)
}
   0xc   :  { %s2305_s12 = scalar_lea.vmem %s36_s25, 256  ;;  %p2310_p4 = scmp.lt.s32.totalorder %s36_s25, %s36_s25 }
   0xd   :  { %p2306_p3 = scmp.ne.s32.totalorder %s36_s25, %s2305_s12  ;;  %p2311_p5 = scmp.lt.s32.totalorder %s2305_s12, %s2305_s12 }
   0xf   :  { %p2312_p6 = por %p2311_p5, %p2310_p4 }
  0x11   :  { %p2313_p7 = pnand %p2312_p6, %p2306_p3 }
  0x13   :  { %2316 = shalt.err (!%p2313_p7)
}
  0x14   :  { %s2461_s13 = smov 128   ;;  %s2462_s14 = smov 8  }
  0x15   :  { %41 = dma.hbm_to_vmem [thread:$0]  %s2729_s1, 256, %s36_s25, [#allocation6], %s2461_s13, %s2461_s13, %s2462_s14  }
  0x16   :  { %s2317_s19 = scalar_lea.hbm %s2732_s4, 512 }
  0x17   :  { %p2318_p8 = scmp.ne.s32.totalorder %s2732_s4, %s2317_s19  ;;  %p2321_p9 = scmp.lt.u32.totalorder %s2317_s19, %s2732_s4 }
  0x19   :  { %p2323_p10 = pnand %p2321_p9, %p2318_p8 }
  0x1b   :  { %2326 = shalt.err (!%p2323_p10)
}
  0x1c   :  { %s2327_s24 = scalar_lea.vmem %s2508_s27, 512  ;;  %p2332_p12 = scmp.lt.s32.totalorder %s2508_s27, %s2508_s27 }
  0x1d   :  { %p2328_p11 = scmp.ne.s32.totalorder %s2508_s27, %s2327_s24  ;;  %p2333_p13 = scmp.lt.s32.totalorder %s2327_s24, %s2327_s24 }
  0x1f   :  { %p2334_p0 = por %p2333_p13, %p2332_p12 }
  0x21   :  { %p2335_p1 = pnand %p2334_p0, %p2328_p11 }
  0x23   :  { %2338 = shalt.err (!%p2335_p1)
}
  0x24   :  { %67 = dma.hbm_to_vmem [thread:$0]  %s2732_s4, 512, %s2508_s27, [#allocation9], %s2461_s13, %s2461_s13, %s2462_s14  }
  0x25   :  { %s2463_s26 = smov [#allocation2]   ;;  %s2464_s29 = smov [#allocation7]  }
  0x26   :  { %s23_s28 = sshll.u32 %s2463_s26, 4  ;;  %s49_s30 = sshll.u32 %s2464_s29, 4  ;;  %s24_s28 = int_to_ptr.vmem [resolvable:$true] %s23_s28  ;;  %s2545_s30 = int_to_ptr.vmem [resolvable:$true] %s49_s30 }
  0x27   :  { %s2339_s10 = scalar_lea.hbm %s2728_s0, 256 }
  0x28   :  { %p2340_p2 = scmp.ne.s32.totalorder %s2728_s0, %s2339_s10  ;;  %p2343_p3 = scmp.lt.u32.totalorder %s2339_s10, %s2728_s0 }
  0x2a   :  { %p2345_p4 = pnand %p2343_p3, %p2340_p2 }
  0x2c   :  { %2348 = shalt.err (!%p2345_p4)
}
  0x2d   :  { %s2349_s4 = scalar_lea.vmem %s24_s28, 256  ;;  %p2354_p6 = scmp.lt.s32.totalorder %s24_s28, %s24_s28 }
  0x2e   :  { %p2350_p5 = scmp.ne.s32.totalorder %s24_s28, %s2349_s4  ;;  %p2355_p7 = scmp.lt.s32.totalorder %s2349_s4, %s2349_s4 }
  0x30   :  { %p2356_p8 = por %p2355_p7, %p2354_p6 }
  0x32   :  { %p2357_p9 = pnand %p2356_p8, %p2350_p5 }
  0x34   :  { %2360 = shalt.err (!%p2357_p9)
}
  0x35   :  { %29 = dma.hbm_to_vmem [thread:$0]  %s2728_s0, 256, %s24_s28, [#allocation3], %s2461_s13, %s2461_s13, %s2462_s14  }
  0x36   :  { %s2361_s20 = scalar_lea.hbm %s2731_s3, 512 }
  0x37   :  { %p2362_p10 = scmp.ne.s32.totalorder %s2731_s3, %s2361_s20  ;;  %p2365_p11 = scmp.lt.u32.totalorder %s2361_s20, %s2731_s3 }
  0x39   :  { %p2367_p12 = pnand %p2365_p11, %p2362_p10 }
  0x3b   :  { %2370 = shalt.err (!%p2367_p12)
}
  0x3c   :  { %s2371_s1 = scalar_lea.vmem %s2545_s30, 512  ;;  %p2376_p0 = scmp.lt.s32.totalorder %s2545_s30, %s2545_s30 }
  0x3d   :  { %p2372_p13 = scmp.ne.s32.totalorder %s2545_s30, %s2371_s1  ;;  %p2377_p1 = scmp.lt.s32.totalorder %s2371_s1, %s2371_s1 }
  0x3f   :  { %p2378_p2 = por %p2377_p1, %p2376_p0 }
  0x41   :  { %p2379_p3 = pnand %p2378_p2, %p2372_p13 }
  0x43   :  { %2382 = shalt.err (!%p2379_p3)
}
  0x44   :  { %55 = dma.hbm_to_vmem [thread:$0]  %s2731_s3, 512, %s2545_s30, [#allocation6], %s2461_s13, %s2461_s13, %s2462_s14  }
  0x45   :  { %s2465_s26 = smov [#allocation10]   ;;  %s2383_s9 = scalar_lea.hbm %s2733_s5, 512 }
  0x46   :  { %s73_s28 = sshll.u32 %s2465_s26, 4  ;;  %p2384_p4 = scmp.ne.s32.totalorder %s2733_s5, %s2383_s9  ;;  %s74_s28 = int_to_ptr.vmem [resolvable:$true] %s73_s28 }
  0x47   :  { %p2387_p5 = scmp.lt.u32.totalorder %s2383_s9, %s2733_s5 }
  0x49   :  { %p2389_p6 = pnand %p2387_p5, %p2384_p4 }
  0x4b   :  { %2392 = shalt.err (!%p2389_p6)
}
  0x4c   :  { %s2393_s16 = scalar_lea.vmem %s74_s28, 512  ;;  %p2398_p8 = scmp.lt.s32.totalorder %s74_s28, %s74_s28 }
  0x4d   :  { %p2394_p7 = scmp.ne.s32.totalorder %s74_s28, %s2393_s16  ;;  %p2399_p9 = scmp.lt.s32.totalorder %s2393_s16, %s2393_s16 }
  0x4f   :  { %p2400_p10 = por %p2399_p9, %p2398_p8 }
  0x51   :  { %p2401_p11 = pnand %p2400_p10, %p2394_p7 }
  0x53   :  { %2404 = shalt.err (!%p2401_p11)
}
  0x54   :  { %79 = dma.hbm_to_vmem [thread:$0]  %s2733_s5, 512, %s74_s28, [#allocation9], %s2461_s13, %s2461_s13, %s2462_s14  }
  0x55   :  { %2449 = dma.done.wait [#allocation3], 256  }
  0x56   :  { %2450 = vsyncadd [#allocation3], 4294967040 }
  0x57   :  { %2451 = dma.done.wait [#allocation6], 768  }
  0x58   :  { %2452 = vsyncadd [#allocation6], 4294966528 }
  0x59   :  { %2453 = dma.done.wait [#allocation9], 1024  }
  0x5a   :  { %2454 = vsyncadd [#allocation9], 4294966272  ;;  %v95_v0 = vld [vmem:[#allocation2] sm:$0xff]  ;;  %v97_v1 = vld [vmem:[#allocation5] sm:$0xff]  ;;  %vm114_vm0 = vcmask 261120  }
  0x5b   :  { %v96_v2 = vld [vmem:[#allocation2 + $0x8] sm:$0xff]  ;;  %v2597_v3 = vadd.f32 %v97_v1, %v95_v0  ;;  %v98_v4 = vld [vmem:[#allocation5 + $0x8] sm:$0xff]  ;;  %v106_v10 = vld [vmem:[#allocation8] sm:$0xff] }
  0x5c   :  { %v2599_v5 = vadd.f32 %v98_v4, %v96_v2  ;;  %v107_v11 = vld [vmem:[#allocation8 + $0x8] sm:$0xff]  ;;  %v149_v12 = vand.u32 4294901760, %v106_v10  ;;  %v108_v15 = vld [vmem:[#allocation8 + $0x10] sm:$0xff]  ;;  %v109_v16 = vld [vmem:[#allocation8 + $0x18] sm:$0xff] }
  0x5d   :  { %v117_v6 = vmul.f32 %v2597_v3, %v2597_v3  ;;  %115 = vst.msk [vmem:[#allocation12] sm:$0xff] %vm114_vm0, %v2597_v3  ;;  %v152_v13 = vand.u32 4294901760, %v107_v11  ;;  %v155_v17 = vand.u32 4294901760, %v108_v15  ;;  %v158_v18 = vand.u32 4294901760, %v109_v16  ;;  %v1791_v49 = vld [vmem:[%s2730_s2] ss:$0 sm:$0xff] }
  0x5e   :  { %v118_v7 = vmul.f32 %v2599_v5, %v2599_v5  ;;  %116 = vst.msk [vmem:[#allocation12 + $0x8] sm:$0xff] %vm114_vm0, %v2599_v5  ;;  %v239_v19 = vsub.f32 %v106_v10, %v149_v12  ;;  %v102_v1 = vld [vmem:[#allocation7] sm:$0xff]  ;;  %v103_v2 = vld [vmem:[#allocation7 + $0x8] sm:$0xff]  ;;  %s2466_s2 = smov [#allocation12]  }
  0x5f   :  { %v119_v8 = vsel %vm114_vm0, %v117_v6, 0.0  ;;  %v2611_v14 = vpack.c.bf16 %v152_v13, %v149_v12  ;;  %v246_v20 = vsub.f32 %v107_v11, %v152_v13  ;;  %v2617_v21 = vpack.c.bf16 %v158_v18, %v155_v17  ;;  %s1773_s27 = sshll.u32 %s2466_s2, 4  ;;  %s1774_s27 = int_to_ptr.vmem [resolvable:$true] %s1773_s27 }
  0x60   :  { %120 = vadd.xlane.f32.xlu0 %v119_v8  ;;  %v122_v9 = vsel %vm114_vm0, %v118_v7, 0.0  ;;  %v240_v22 = vand.u32 4294901760, %v239_v19  ;;  %v253_v27 = vsub.f32 %v108_v15, %v155_v17  ;;  %v260_v28 = vsub.f32 %v109_v16, %v158_v18  ;;  %v104_v7 = vld [vmem:[#allocation7 + $0x10] sm:$0xff]  ;;  %v105_v8 = vld [vmem:[#allocation7 + $0x18] sm:$0xff]  ;;  %s2405_s17 = scalar_lea.vmem %s1774_s27, 256  ;;  %p2410_p13 = scmp.lt.s32.totalorder %s1774_s27, %s1774_s27 }
  0x61   :  { %2125 = vmatprep.subr.bf16.mxu0 %v2611_v14  ;;  %2101 = vmatprep.subr.bf16.mxu1 %v2611_v14  ;;  %v247_v23 = vand.u32 4294901760, %v246_v20  ;;  %v2116_v40 = vpack.c.bf16 %v246_v20, %v239_v19  ;;  %v694_v6 = vand.u32 4294901760, %v103_v2  ;;  %v700_v10 = vand.u32 4294901760, %v105_v8  ;;  %p2406_p12 = scmp.ne.s32.totalorder %s1774_s27, %s2405_s17  ;;  %p2411_p0 = scmp.lt.s32.totalorder %s2405_s17, %s2405_s17 }
  0x62   :  { %2127 = vmatpush3.bf16.msra.mxu0 %v2611_v14  ;;  %2103 = vmatpush3.bf16.msra.mxu1 %v2611_v14  ;;  %v241_v24 = vsub.f32 %v239_v19, %v240_v22  ;;  %v254_v31 = vand.u32 4294901760, %v253_v27  ;;  %v261_v32 = vand.u32 4294901760, %v260_v28  ;;  %v2623_v41 = vpack.c.bf16 %v260_v28, %v253_v27 }
  0x63   :  { %2129 = vmatprep.subr.bf16.mxu0 %v2617_v21  ;;  %2105 = vmatprep.subr.bf16.mxu1 %v2617_v21  ;;  %v248_v25 = vsub.f32 %v246_v20, %v247_v23  ;;  %v2132_v26 = vpack.c.bf16 %v247_v23, %v240_v22  ;;  %v788_v12 = vsub.f32 %v103_v2, %v694_v6  ;;  %p2412_p1 = por %p2411_p0, %p2410_p13 }
  0x64   :  { %123 = vadd.xlane.f32.xlu0 %v122_v9  ;;  %v242_v29 = vand.u32 4294901760, %v241_v24  ;;  %v255_v34 = vsub.f32 %v253_v27, %v254_v31  ;;  %v262_v35 = vsub.f32 %v260_v28, %v261_v32  ;;  %v2136_v36 = vpack.c.bf16 %v261_v32, %v254_v31 }
  0x65   :  { %v249_v30 = vand.u32 4294901760, %v248_v25  ;;  %v697_v9 = vand.u32 4294901760, %v104_v7  ;;  %v789_v15 = vand.u32 4294901760, %v788_v12  ;;  %v802_v17 = vsub.f32 %v105_v8, %v700_v10  ;;  %p2413_p2 = pnand %p2412_p1, %p2406_p12 }
  0x66   :  { %2131 = vmatpush3.bf16.msra.mxu0 %v2617_v21  ;;  %2107 = vmatpush3.bf16.msra.mxu1 %v2617_v21  ;;  %v256_v37 = vand.u32 4294901760, %v255_v34  ;;  %v263_v38 = vand.u32 4294901760, %v262_v35  ;;  %v110_v35 = vld [vmem:[#allocation10] sm:$0xff] }
  0x67   :  { %2133 = vmatprep.subr.bf16.mxu0 %v2132_v26  ;;  %v2108_v33 = vpack.c.bf16 %v249_v30, %v242_v29  ;;  %v795_v16 = vsub.f32 %v104_v7, %v697_v9  ;;  %v790_v19 = vsub.f32 %v788_v12, %v789_v15  ;;  %v803_v22 = vand.u32 4294901760, %v802_v17 }
  0x68   :  { %v2112_v39 = vpack.c.bf16 %v263_v38, %v256_v37  ;;  %v2152_v23 = vpack.c.bf16 %v700_v10, %v697_v9  ;;  %v1227_v37 = vand.u32 4294901760, %v110_v35 }
  0x69   :  { %2109 = vmatprep.subr.bf16.mxu1 %v2108_v33  ;;  %v796_v20 = vand.u32 4294901760, %v795_v16  ;;  %v791_v25 = vand.u32 4294901760, %v790_v19  ;;  %v804_v27 = vsub.f32 %v802_v17, %v803_v22  ;;  %v2168_v32 = vpack.c.bf16 %v802_v17, %v795_v16 }
  0x6b   :  { %v805_v29 = vand.u32 4294901760, %v804_v27  ;;  %v2184_v34 = vpack.c.bf16 %v803_v22, %v796_v20 }
  0xed   :  { %v121_v42 = vpop.xlane.xlu0 %120 }
  0xee   :  { %v126_v43 = vmul.f32 0.03125, %v121_v42  ;;  %v112_v42 = vld [vmem:[#allocation10 + $0x10] sm:$0xff] }
  0xf0   :  { %v128_v44 = vadd.f32 1e-05, %v126_v43  ;;  %v113_v43 = vld [vmem:[#allocation10 + $0x18] sm:$0xff] }
  0xf1   :  { %v124_v45 = vpop.xlane.xlu0 %123 }
  0xf2   :  { %2283 = vrsqrt.f32 %v128_v44  ;;  %v127_v46 = vmul.f32 0.03125, %v124_v45  ;;  %v1233_v44 = vand.u32 4294901760, %v112_v42  ;;  %v1236_v45 = vand.u32 4294901760, %v113_v43 }
  0xf4   :  { %v129_v47 = vadd.f32 1e-05, %v127_v46 }
  0xf6   :  { %2285 = vrsqrt.f32 %v129_v47 }
  0xfc   :  { %v2284_v48 = vpop.eup %2283 }
  0xfd   :  { %v132_v50 = vmul.f32 %v2284_v48, %v2597_v3  ;;  %v2682_v48 = vpack.c.bf16 %v1236_v45, %v1233_v44 }
  0xff   :  { %v140_v51 = vmul.f32 %v1791_v49, %v132_v50 }
 0x100   :  { %v2286_v52 = vpop.eup %2285 }
 0x101   :  { %v133_v53 = vmul.f32 %v2286_v52, %v2599_v5  ;;  %v143_v54 = vsel %vm114_vm0, %v140_v51, 0  ;;  %v691_v5 = vand.u32 4294901760, %v102_v1  ;;  %v1331_v51 = vsub.f32 %v112_v42, %v1233_v44 }
 0x102   :  { %v2631_v55 = vand.u32 4294901760, %v143_v54  ;;  %v1338_v52 = vsub.f32 %v113_v43, %v1236_v45 }
 0x103   :  { %v141_v56 = vmul.f32 %v1791_v49, %v133_v53  ;;  %v781_v11 = vsub.f32 %v102_v1, %v691_v5  ;;  %v2148_v18 = vpack.c.bf16 %v694_v6, %v691_v5 }
 0x104   :  { %v2634_v57 = vsub.f32 %v143_v54, %v2631_v55 }
 0x105   :  { %v146_v58 = vsel %vm114_vm0, %v141_v56, 0  ;;  %v782_v13 = vand.u32 4294901760, %v781_v11  ;;  %v2164_v31 = vpack.c.bf16 %v788_v12, %v781_v11  ;;  %v1339_v56 = vand.u32 4294901760, %v1338_v52 }
 0x106   :  { %v2638_v59 = vand.u32 4294901760, %v2634_v57  ;;  %v2640_v60 = vand.u32 4294901760, %v146_v58 }
 0x108   :  { %1943 = vmatprep.mubr.f32.mxu0 %v2638_v59  ;;  %v220_v61 = vsub.f32 %v2634_v57, %v2638_v59  ;;  %v2646_v62 = vsub.f32 %v146_v58, %v2640_v60 }
 0x10a   :  { %v221_v63 = vand.u32 4294901760, %v220_v61  ;;  %v2649_v0 = vand.u32 4294901760, %v2646_v62 }
 0x10c   :  { %1910 = vmatprep.mubr.f32.mxu1 %v221_v63  ;;  %1944 = vmatmul.mubr.f32.vlgmr.msra.gmra.mrb[0].mxu0 %v2649_v0  ;;  %v230_v3 = vsub.f32 %v2646_v62, %v2649_v0 }
 0x10d   :  { %2135 = vmatpush3.bf16.msra.mxu0 %v2132_v26  ;;  %1954 = vmatprep.mubr.f32.mxu0 %v2631_v55  ;;  %v797_v26 = vsub.f32 %v795_v16, %v796_v20 }
 0x10e   :  { %v231_v4 = vand.u32 4294901760, %v230_v3  ;;  %2137 = vmatprep.subr.bf16.mxu0 %v2136_v36 }
 0x10f   :  { %v798_v28 = vand.u32 4294901760, %v797_v26 }
 0x110   :  { %1911 = vmatmul.mubr.f32.vlgmr.msra.gmra.mrb[0].mxu1 %v231_v4 }
 0x111   :  { %2111 = vmatpush3.bf16.msra.mxu1 %v2108_v33  ;;  %1921 = vmatprep.mubr.f32.mxu1 %v2631_v55  ;;  %v2160_v30 = vpack.c.bf16 %v805_v29, %v798_v28  ;;  %v2180_v33 = vpack.c.bf16 %v789_v15, %v782_v13 }
 0x112   :  { %2139 = vmatpush3.bf16.msra.mxu0 %v2136_v36  ;;  %2113 = vmatprep.subr.bf16.mxu1 %v2112_v39  ;;  %v111_v36 = vld [vmem:[#allocation10 + $0x8] sm:$0xff] }
 0x113   :  { %2141 = vmatprep.subr.bf16.mxu0 %v2611_v14  ;;  %v1230_v38 = vand.u32 4294901760, %v111_v36 }
 0x115   :  { %2115 = vmatpush3.bf16.msra.mxu1 %v2112_v39  ;;  %1955 = vmatmul.mubr.f32.vlgmr.msra.gmra.mrb[0].mxu0 %v2640_v60  ;;  %v2678_v39 = vpack.c.bf16 %v1230_v38, %v1227_v37 }
 0x116   :  { %2143 = vmatpush3.bf16.msra.mxu0 %v2611_v14  ;;  %1965 = vmatprep.mubr.f32.mxu0 %v2631_v55  ;;  %v783_v14 = vsub.f32 %v781_v11, %v782_v13 }
 0x117   :  { %2117 = vmatprep.subr.bf16.mxu1 %v2116_v40  ;;  %2145 = vmatprep.subr.bf16.mxu0 %v2617_v21 }
 0x118   :  { %1922 = vmatmul.mubr.f32.vlgmr.msra.gmra.mrb[0].mxu1 %v2640_v60  ;;  %v784_v24 = vand.u32 4294901760, %v783_v14 }
 0x119   :  { %2119 = vmatpush3.bf16.msra.mxu1 %v2116_v40  ;;  %1932 = vmatprep.mubr.f32.mxu1 %v2634_v57  ;;  %v1317_v40 = vsub.f32 %v110_v35, %v1227_v37 }
 0x11a   :  { %2147 = vmatpush3.bf16.msra.mxu0 %v2617_v21  ;;  %2121 = vmatprep.subr.bf16.mxu1 %v2623_v41  ;;  %v2156_v21 = vpack.c.bf16 %v791_v25, %v784_v24 }
 0x11b   :  { %2197 = vmatprep.subr.bf16.mxu0 %v2678_v39  ;;  %v1318_v46 = vand.u32 4294901760, %v1317_v40 }
 0x11d   :  { %2123 = vmatpush3.bf16.msra.mxu1 %v2623_v41  ;;  %1966 = vmatmul.mubr.f32.vlgmr.msra.gmra.mrb[0].mxu0 %v2640_v60  ;;  %v1324_v41 = vsub.f32 %v111_v36, %v1230_v38  ;;  %v1319_v49 = vsub.f32 %v1317_v40, %v1318_v46 }
 0x11e   :  { %2149 = vmatprep.subr.bf16.mxu1 %v2148_v18  ;;  %2199 = vmatpush3.bf16.msra.mxu0 %v2678_v39 }
 0x11f   :  { %v1325_v47 = vand.u32 4294901760, %v1324_v41  ;;  %2201 = vmatprep.subr.bf16.mxu0 %v2682_v48  ;;  %v1320_v53 = vand.u32 4294901760, %v1319_v49 }
 0x120   :  { %1933 = vmatmul.mubr.f32.vlgmr.msra.gmra.mrb[0].mxu1 %v2646_v62 }
 0x121   :  { %2151 = vmatpush3.bf16.msra.mxu1 %v2148_v18  ;;  %1976 = vmatprep.mubr.f32.mxu1 %v221_v63  ;;  %v1326_v50 = vsub.f32 %v1324_v41, %v1325_v47  ;;  %v2212_v63 = vpack.c.bf16 %v1324_v41, %v1317_v40  ;;  %v2228_v1 = vpack.c.bf16 %v1325_v47, %v1318_v46 }
 0x122   :  { %2153 = vmatprep.subr.bf16.mxu1 %v2152_v23  ;;  %2203 = vmatpush3.bf16.msra.mxu0 %v2682_v48 }
 0x123   :  { %v1327_v54 = vand.u32 4294901760, %v1326_v50 }
 0x125   :  { %2155 = vmatpush3.bf16.msra.mxu1 %v2152_v23 }
 0x126   :  { %2157 = vmatprep.subr.bf16.mxu1 %v2156_v21 }
 0x128   :  { %1977 = vmatmul.mubr.f32.vlgmr.msra.gmra.mrb[2].mxu1 %v231_v4 }
 0x129   :  { %2159 = vmatpush3.bf16.msra.mxu1 %v2156_v21  ;;  %1987 = vmatprep.mubr.f32.mxu1 %v2631_v55 }
 0x12a   :  { %2161 = vmatprep.subr.bf16.mxu1 %v2160_v30 }
 0x12d   :  { %2163 = vmatpush3.bf16.msra.mxu1 %v2160_v30 }
 0x12e   :  { %2165 = vmatprep.subr.bf16.mxu1 %v2164_v31 }
 0x130   :  { %1988 = vmatmul.mubr.f32.vlgmr.msra.gmra.mrb[2].mxu1 %v2640_v60 }
 0x131   :  { %2167 = vmatpush3.bf16.msra.mxu1 %v2164_v31  ;;  %1998 = vmatprep.mubr.f32.mxu1 %v2634_v57  ;;  %v2204_v57 = vpack.c.bf16 %v1327_v54, %v1320_v53 }
 0x132   :  { %2169 = vmatprep.subr.bf16.mxu1 %v2168_v32 }
 0x133   :  { %2205 = vmatprep.subr.bf16.mxu0 %v2204_v57 }
 0x135   :  { %2171 = vmatpush3.bf16.msra.mxu1 %v2168_v32 }
 0x136   :  { %2173 = vmatprep.subr.bf16.mxu1 %v2148_v18 }
 0x138   :  { %1999 = vmatmul.mubr.f32.vlgmr.msra.gmra.mrb[2].mxu1 %v2646_v62 }
 0x139   :  { %2175 = vmatpush3.bf16.msra.mxu1 %v2148_v18  ;;  %2009 = vmatprep.mubr.f32.mxu1 %v2638_v59  ;;  %v1340_v59 = vsub.f32 %v1338_v52, %v1339_v56 }
 0x13a   :  { %2177 = vmatprep.subr.bf16.mxu1 %v2152_v23 }
 0x13b   :  { %v1341_v61 = vand.u32 4294901760, %v1340_v59 }
 0x13d   :  { %2179 = vmatpush3.bf16.msra.mxu1 %v2152_v23 }
 0x13e   :  { %2181 = vmatprep.subr.bf16.mxu1 %v2180_v33 }
 0x140   :  { %2010 = vmatmul.mubr.f32.vlgmr.msra.gmra.mrb[2].mxu1 %v2649_v0  ;;  %v2216_v0 = vpack.c.bf16 %v1338_v52, %v1331_v51 }
 0x141   :  { %2183 = vmatpush3.bf16.msra.mxu1 %v2180_v33  ;;  %2020 = vmatprep.mubr.f32.mxu1 %v2631_v55 }
 0x142   :  { %2185 = vmatprep.subr.bf16.mxu1 %v2184_v34 }
 0x145   :  { %2187 = vmatpush3.bf16.msra.mxu1 %v2184_v34 }
 0x146   :  { %2189 = vmatprep.subr.bf16.mxu1 %v2148_v18 }
 0x148   :  { %2021 = vmatmul.mubr.f32.vlgmr.msra.gmra.mrb[2].mxu1 %v2640_v60 }
 0x149   :  { %2191 = vmatpush3.bf16.msra.mxu1 %v2148_v18  ;;  %2031 = vmatprep.mubr.f32.mxu1 %v2631_v55  ;;  %v1332_v55 = vand.u32 4294901760, %v1331_v51 }
 0x14a   :  { %2193 = vmatprep.subr.bf16.mxu1 %v2152_v23 }
 0x14b   :  { %v1333_v58 = vsub.f32 %v1331_v51, %v1332_v55  ;;  %v2232_v2 = vpack.c.bf16 %v1339_v56, %v1332_v55 }
 0x14d   :  { %2195 = vmatpush3.bf16.msra.mxu1 %v2152_v23 }
 0x150   :  { %2032 = vmatmul.mubr.f32.vlgmr.msra.gmra.mrb[2].mxu1 %v2640_v60  ;;  %v1334_v60 = vand.u32 4294901760, %v1333_v58 }
 0x152   :  { %v2208_v62 = vpack.c.bf16 %v1341_v61, %v1334_v60 }
 0x1f0   :  { %v1967_v3 = vpop.f32.mrb[0].mxu0 }
 0x1f1   :  { %v666_v4 = vpop.f32.mrb[1].mxu0 }
 0x1f3   :  { %v1934_v5 = vpop.f32.mrb[0].mxu1 }
 0x1f4   :  { %v2244_v6 = vadd.f32 %v1967_v3, %v1934_v5  ;;  %v410_v7 = vpop.f32.mrb[1].mxu1 }
 0x1f5   :  { %v2245_v8 = vadd.f32 %v666_v4, %v410_v7 }
 0x1f6   :  { %v1793_v9 = vmul.f32 -1.442695, %v2244_v6 }
 0x1f7   :  { %v1792_v10 = vmul.f32 -1.442695, %v2245_v8 }
 0x1f8   :  { %2287 = vpow2.f32 %v1793_v9 }
 0x1f9   :  { %2289 = vpow2.f32 %v1792_v10 }
 0x202   :  { %v2288_v11 = vpop.eup %2287 }
 0x203   :  { %v2290_v12 = vpop.eup %2289  ;;  %v683_v13 = vadd.f32 1.0, %v2288_v11 }
 0x204   :  { %v682_v15 = vadd.f32 1.0, %v2290_v12 }
 0x205   :  { %2291 = vrcp.f32 %v683_v13 }
 0x206   :  { %2293 = vrcp.f32 %v682_v15 }
 0x20f   :  { %v2292_v16 = vpop.eup %2291 }
 0x210   :  { %v2294_v17 = vpop.eup %2293  ;;  %v689_v18 = vmul.f32 %v2292_v16, %v2244_v6 }
 0x211   :  { %v688_v19 = vmul.f32 %v2294_v17, %v2245_v8 }
 0x223   :  { %v2033_v14 = vpop.f32.mrb[2].mxu1 }
 0x224   :  { %v1219_v20 = vmul.f32 %v2033_v14, %v689_v18  ;;  %v1208_v22 = vpop.f32.mrb[3].mxu1 }
 0x225   :  { %v1218_v23 = vmul.f32 %v1208_v22, %v688_v19 }
 0x226   :  { %v1224_v24 = vsel %vm114_vm0, %v1219_v20, 0 }
 0x227   :  { %v1305_v25 = vand.u32 4294901760, %v1224_v24  ;;  %v1221_v26 = vsel %vm114_vm0, %v1218_v23, 0 }
 0x228   :  { %v1295_v27 = vand.u32 4294901760, %v1221_v26 }
 0x229   :  { %v1306_v21 = vsub.f32 %v1224_v24, %v1305_v25 }
 0x22a   :  { %v1296_v28 = vsub.f32 %v1221_v26, %v1295_v27 }
 0x22b   :  { %v1307_v29 = vand.u32 4294901760, %v1306_v21 }
 0x22c   :  { %v1297_v30 = vand.u32 4294901760, %v1296_v28 }
 0x22d   :  { %v1308_v31 = vsub.f32 %v1306_v21, %v1307_v29 }
 0x22e   :  { %v1298_v32 = vsub.f32 %v1296_v28, %v1297_v30 }
 0x22f   :  { %v1309_v34 = vand.u32 4294901760, %v1308_v31 }
 0x230   :  { %v1299_v33 = vand.u32 4294901760, %v1298_v32 }
 0x232   :  { %2042 = vmatprep.mubr.f32.mxu0 %v1299_v33 }
 0x233   :  { %2043 = vmatmul.mubr.f32.vlgmr.msra.gmra.mrb[2].mxu0 %v1309_v34 }
 0x234   :  { %2207 = vmatpush3.bf16.msra.mxu0 %v2204_v57  ;;  %2053 = vmatprep.mubr.f32.mxu0 %v1295_v27 }
 0x235   :  { %2209 = vmatprep.subr.bf16.mxu0 %v2208_v62 }
 0x238   :  { %2211 = vmatpush3.bf16.msra.mxu0 %v2208_v62 }
 0x239   :  { %2213 = vmatprep.subr.bf16.mxu0 %v2212_v63 }
 0x23b   :  { %2054 = vmatmul.mubr.f32.vlgmr.msra.gmra.mrb[2].mxu0 %v1305_v25 }
 0x23c   :  { %2215 = vmatpush3.bf16.msra.mxu0 %v2212_v63  ;;  %2064 = vmatprep.mubr.f32.mxu0 %v1296_v28 }
 0x23d   :  { %2217 = vmatprep.subr.bf16.mxu0 %v2216_v0 }
 0x240   :  { %2219 = vmatpush3.bf16.msra.mxu0 %v2216_v0 }
 0x241   :  { %2221 = vmatprep.subr.bf16.mxu0 %v2678_v39 }
 0x243   :  { %2065 = vmatmul.mubr.f32.vlgmr.msra.gmra.mrb[2].mxu0 %v1306_v21 }
 0x244   :  { %2223 = vmatpush3.bf16.msra.mxu0 %v2678_v39  ;;  %2075 = vmatprep.mubr.f32.mxu0 %v1297_v30 }
 0x245   :  { %2225 = vmatprep.subr.bf16.mxu0 %v2682_v48 }
 0x248   :  { %2227 = vmatpush3.bf16.msra.mxu0 %v2682_v48 }
 0x249   :  { %2229 = vmatprep.subr.bf16.mxu0 %v2228_v1 }
 0x24b   :  { %2076 = vmatmul.mubr.f32.vlgmr.msra.gmra.mrb[2].mxu0 %v1307_v29 }
 0x24c   :  { %2231 = vmatpush3.bf16.msra.mxu0 %v2228_v1  ;;  %2086 = vmatprep.mubr.f32.mxu0 %v1295_v27 }
 0x24d   :  { %2233 = vmatprep.subr.bf16.mxu0 %v2232_v2 }
 0x250   :  { %2235 = vmatpush3.bf16.msra.mxu0 %v2232_v2 }
 0x251   :  { %2237 = vmatprep.subr.bf16.mxu0 %v2678_v39 }
 0x253   :  { %2087 = vmatmul.mubr.f32.vlgmr.msra.gmra.mrb[2].mxu0 %v1305_v25 }
 0x254   :  { %2239 = vmatpush3.bf16.msra.mxu0 %v2678_v39  ;;  %2097 = vmatprep.mubr.f32.mxu0 %v1295_v27 }
 0x255   :  { %2241 = vmatprep.subr.bf16.mxu0 %v2682_v48 }
 0x258   :  { %2243 = vmatpush3.bf16.msra.mxu0 %v2682_v48 }
 0x25b   :  { %2098 = vmatmul.mubr.f32.vlgmr.msra.gmra.mrb[2].mxu0 %v1305_v25 }
 0x25c   :  { %2416 = shalt.err (!%p2413_p2)
}
 0x25d   :  { %s2417_s20 = scalar_lea.hbm %s2735_s7, 256 }
 0x25e   :  { %p2418_p3 = scmp.ne.s32.totalorder %s2735_s7, %s2417_s20  ;;  %p2421_p4 = scmp.lt.u32.totalorder %s2417_s20, %s2735_s7 }
 0x260   :  { %p2423_p5 = pnand %p2421_p4, %p2418_p3 }
 0x262   :  { %2426 = shalt.err (!%p2423_p5)
}
 0x263   :  { %1779 = dma.vmem_to_hbm [thread:$0]  %s1774_s27, 256, %s2735_s7, [#allocation13], %s2461_s13, %s2461_s13, %s2462_s14  }
 0x264   :  { %s2467_s25 = smov [#allocation11]  }
 0x265   :  { %s1761_s26 = sshll.u32 %s2467_s25, 4  ;;  %s1762_s26 = int_to_ptr.vmem [resolvable:$true] %s1761_s26 }
 0x266   :  { %s2427_s28 = scalar_lea.vmem %s1762_s26, 256  ;;  %p2432_p7 = scmp.lt.s32.totalorder %s1762_s26, %s1762_s26 }
 0x267   :  { %p2428_p6 = scmp.ne.s32.totalorder %s1762_s26, %s2427_s28  ;;  %p2433_p8 = scmp.lt.s32.totalorder %s2427_s28, %s2427_s28 }
 0x269   :  { %p2434_p9 = por %p2433_p8, %p2432_p7 }
 0x26b   :  { %p2435_p10 = pnand %p2434_p9, %p2428_p6 }
 0x32e   :  { %v2099_v35 = vpop.f32.mrb[2].mxu0 }
 0x32f   :  { %1755 = vst.msk [vmem:[#allocation11 + $0x8] sm:$0xff] %vm114_vm0, %v2099_v35  ;;  %v1744_v36 = vpop.f32.mrb[3].mxu0 }
 0x330   :  { %1754 = vst.msk [vmem:[#allocation11] sm:$0xff] %vm114_vm0, %v1744_v36 }
 0x331   :  { %2438 = shalt.err (!%p2435_p10)
}
 0x332   :  { %s2439_s7 = scalar_lea.hbm %s2734_s6, 256 }
 0x333   :  { %p2440_p11 = scmp.ne.s32.totalorder %s2734_s6, %s2439_s7  ;;  %p2443_p12 = scmp.lt.u32.totalorder %s2439_s7, %s2734_s6 }
 0x335   :  { %p2445_p13 = pnand %p2443_p12, %p2440_p11 }
 0x337   :  { %2448 = shalt.err (!%p2445_p13)
}
 0x338   :  { %1767 = dma.vmem_to_hbm [thread:$0]  %s1762_s26, 256, %s2734_s6, [#allocation4], %s2461_s13, %s2461_s13, %s2462_s14  }
 0x339   :  { %2455 = dma.done.wait [#allocation4], 256  }
 0x33a   :  { %2456 = vsyncadd [#allocation4], 4294967040 }
 0x33b   :  { %2457 = dma.done.wait [#allocation13], 256  }
 0x33c   :  { %2458 = vsyncadd [#allocation13], 4294967040 }
 0x33d   :  { %1786 = vsyncpa [#allocation3], 1 }
 0x33e   :  { %1787 = vsyncpa [#allocation6], 1 }
 0x33f   :  { %1788 = vsyncpa [#allocation9], 1 }
 0x340   :  { %1789 = vsyncpa [#allocation4], 1 }
 0x341   :  { %1790 = vsyncpa [#allocation13], 1 }

</bundles_post_ra>
